<compile_context>
chip_gen: v7x
topology: tpu7x:2x2x1
jax: 0.10.0
libtpu: 0.0.40
codegen_flags: <defaults>
</compile_context>

<pallas_src>
import functools
import math

import numpy as np

import jax
import jax.numpy as jnp
from jax import lax
from jax.experimental import pallas as pl
from jax.experimental.pallas import tpu as pltpu

EPS = 1e-5          # nn.GroupNorm default eps
LANE = 128          # TPU lane width; output-channel padding target


def _round_up(x, m):
    return ((x + m - 1) // m) * m


def _cdiv(a, b):
    return -(-a // b)


def _lcm(a, b):
    return a * b // math.gcd(a, b)


def _tpu_vmem_capacity():
    try:
        return int(pltpu.get_tpu_info().vmem_capacity_bytes)
    except Exception:
        return 64 * 1024 * 1024        # conservative fallback (v7x per-TC VMEM)


def _invariant_spec(block_shape, index_map):
    """BlockSpec for a grid-invariant operand: single VMEM buffer, no double-buffering."""
    try:
        return pl.BlockSpec(block_shape, index_map, pipeline_mode=pl.Buffered(1))
    except Exception:                  # older jax without pipeline_mode / Buffered(1)
        return pl.BlockSpec(block_shape, index_map)


def _pick_pass2_tile(Y, tL, bytes_per_row, budget):
    """Largest multiple of tL dividing Y whose (double-buffered in+out) block fits budget."""
    nT = Y // tL
    for f in range(nT, 0, -1):
        if nT % f == 0 and tL * f * bytes_per_row <= budget:
            return tL * f
    return tL


# --------------------------------------------------------------------------- #
# Kernels
# --------------------------------------------------------------------------- #
def _conv_stats_kernel(*refs, G, tL, L_valid, t_boundary, boundary_partial):
    """Tap-sum conv for one (batch, time-tile) block + per-channel sum / sum-sq.

    refs (G > 1):  xm (1,tL,SC), xh (1,halo,SC), w (G,SC,C), y (1,tL,C),
                   sum (1,1,C), ssq (1,1,C)
    refs (G == 1): xm, w, y, sum, ssq            (no halo input at all)
    """
    if G > 1:
        xm_ref, xh_ref, w_ref, y_ref, sum_ref, ssq_ref = refs
    else:
        xm_ref, w_ref, y_ref, sum_ref, ssq_ref = refs
    t = pl.program_id(1)

    # Conv: sum of G shifted (tL, SC) @ (SC, C) MXU matmuls, fp32 accumulation.
    xm = xm_ref[0]
    acc = jnp.dot(xm, w_ref[0], preferred_element_type=jnp.float32)
    if G > 1:
        # TODO(synk): split-M dots straight from the refs would avoid this
        # (tL+halo, SC) VMEM temp and the unaligned per-tap slices.
        win = jnp.concatenate([xm, xh_ref[0]], axis=0)
        for q in range(1, G):
            acc = acc + jnp.dot(win[q:q + tL], w_ref[q],
                                preferred_element_type=jnp.float32)

    y_ref[0] = acc.astype(y_ref.dtype)

    @pl.when(t == 0)
    def _():
        sum_ref[...] = jnp.zeros_like(sum_ref)
        ssq_ref[...] = jnp.zeros_like(ssq_ref)

    def _acc_stats(v):
        sum_ref[0] = sum_ref[0] + jnp.sum(v, axis=0, keepdims=True)
        ssq_ref[0] = ssq_ref[0] + jnp.sum(v * v, axis=0, keepdims=True)

    if boundary_partial:
        if t_boundary > 0:
            @pl.when(t < t_boundary)
            def _():
                _acc_stats(acc)                       # interior tiles: no masking

        @pl.when(t == t_boundary)
        def _():                                      # only the boundary tile masks
            row = t * tL + lax.broadcasted_iota(jnp.int32, (tL, 1), 0)
            _acc_stats(jnp.where(row < L_valid, acc, 0.0))
    else:
        @pl.when(t <= t_boundary)
        def _():
            _acc_stats(acc)
    # tiles with t > t_boundary contribute nothing to the statistics.


def _norm_act_kernel(y_ref, sum_ref, ssq_ref, o_ref, *, inv_n, L_valid,
                     t_boundary, boundary_partial, zero_tiles, log_compression):
    """Instance norm (one-pass stats), ReLU, optional fused log(1+x), tail zeroing."""
    t = pl.program_id(1)
    tL = o_ref.shape[1]

    mean = sum_ref[0] * inv_n                                    # (1, C)
    var = jnp.maximum(ssq_ref[0] * inv_n - mean * mean, 0.0)     # one-pass, clamped
    # TODO(synk): one-pass variance can lose precision vs the reference's two-pass
    # (y - mean)^2 when |mean| >> std at very long sequence lengths.
    inv_std = lax.rsqrt(var + EPS)

    def _normalize(mask_tail):
        z = (y_ref[0].astype(jnp.float32) - mean) * inv_std
        z = jnp.maximum(z, 0.0)
        if log_compression:
            z = jnp.log(z + 1.0)          # z >= 0 after ReLU, abs() not needed
        if mask_tail:
            row = t * tL + lax.broadcasted_iota(jnp.int32, (tL, 1), 0)
            z = jnp.where(row < L_valid, z, 0.0)
        o_ref[0] = z.astype(o_ref.dtype)

    if t_boundary == 0 and not zero_tiles:            # single-tile fast path
        _normalize(boundary_partial)
        return

    if t_boundary > 0:
        @pl.when(t < t_boundary)
        def _():
            _normalize(False)

    @pl.when(t == t_boundary)
    def _():
        _normalize(boundary_partial)

    if zero_tiles:
        @pl.when(t > t_boundary)
        def _():
            o_ref[...] = jnp.zeros_like(o_ref)


# --------------------------------------------------------------------------- #
# One conv block = Conv1d -> Dropout(p=0) -> instance norm -> ReLU
# --------------------------------------------------------------------------- #
def conv_block(x_r, w_packed, *, G, halo, tL, nT, L_out, out_dtype,
               log_compression, vmem_limit, pass2_budget):
    """x_r: (B, nGroups, SC) stride-folded input; w_packed: (G, SC, C).

    Returns (B, nT*tL, C) in out_dtype with rows >= L_out exactly zero so the
    next layer can stride-fold it with a pure reshape (no pad / slice / cast).
    """
    B, nGroups, SC = x_r.shape
    _, _, C = w_packed.shape
    Y = nT * tL
    assert nGroups >= Y + halo and Y >= L_out > 0

    compute_dtype = x_r.dtype
    t_boundary = (L_out - 1) // tL
    boundary_partial = (L_out % tL) != 0

    # ---- pass 1: conv + per-channel sum / sum-of-squares -------------------
    in_specs = [pl.BlockSpec((1, tL, SC), lambda b, t: (b, t, 0))]
    args = [x_r]
    if G > 1:
        hb = tL // halo
        in_specs.append(pl.BlockSpec((1, halo, SC), lambda b, t: (b, (t + 1) * hb, 0)))
        args.append(x_r)
    # grid-invariant weights: single VMEM buffer instead of a double buffer.
    in_specs.append(_invariant_spec((G, SC, C), lambda b, t: (0, 0, 0)))
    args.append(w_packed)

    kernel1 = functools.partial(_conv_stats_kernel, G=G, tL=tL, L_valid=L_out,
                                t_boundary=t_boundary,
                                boundary_partial=boundary_partial)
    y, s, ss = pl.pallas_call(
        kernel1,
        out_shape=(jax.ShapeDtypeStruct((B, Y, C), compute_dtype),   # y in compute dtype
                   jax.ShapeDtypeStruct((B, 1, C), jnp.float32),
                   jax.ShapeDtypeStruct((B, 1, C), jnp.float32)),
        grid_spec=pltpu.PrefetchScalarGridSpec(
            num_scalar_prefetch=0,
            grid=(B, nT),
            in_specs=in_specs,
            out_specs=(
                pl.BlockSpec((1, tL, C), lambda b, t: (b, t, 0)),
                pl.BlockSpec((1, 1, C), lambda b, t: (b, 0, 0)),
                pl.BlockSpec((1, 1, C), lambda b, t: (b, 0, 0)),
            )),
        compiler_params=pltpu.CompilerParams(
            dimension_semantics=("parallel", "arbitrary"),
            vmem_limit_bytes=vmem_limit),
    )(*args)

    # ---- pass 2: normalize + ReLU (+ fused log) + zero the padded tail -----
    in_b = np.dtype(compute_dtype).itemsize
    out_b = np.dtype(out_dtype).itemsize
    tL2 = _pick_pass2_tile(Y, tL, C * 2 * (in_b + out_b), pass2_budget)
    nT2 = Y // tL2
    tb2 = (L_out - 1) // tL2
    kernel2 = functools.partial(
        _norm_act_kernel, inv_n=1.0 / L_out, L_valid=L_out, t_boundary=tb2,
        boundary_partial=(L_out % tL2) != 0, zero_tiles=(nT2 - 1 > tb2),
        log_compression=log_compression)
    act = pl.pallas_call(
        kernel2,
        out_shape=jax.ShapeDtypeStruct((B, Y, C), out_dtype),
        grid_spec=pltpu.PrefetchScalarGridSpec(
            num_scalar_prefetch=0,
            grid=(B, nT2),
            in_specs=[
                pl.BlockSpec((1, tL2, C), lambda b, t: (b, t, 0)),
                pl.BlockSpec((1, 1, C), lambda b, t: (b, 0, 0)),
                pl.BlockSpec((1, 1, C), lambda b, t: (b, 0, 0)),
            ],
            out_specs=pl.BlockSpec((1, tL2, C), lambda b, t: (b, t, 0))),
        compiler_params=pltpu.CompilerParams(
            dimension_semantics=("parallel", "parallel"),
            vmem_limit_bytes=vmem_limit),
    )(y, s, ss)
    return act


# --------------------------------------------------------------------------- #
# Model
# --------------------------------------------------------------------------- #
class ConvFeatureExtractionModelPallas:
    """Pallas port of ConvFeatureExtractionModel (dropout=0, is_instance_norm=True).

    With is_instance_norm=True the norm is Fp32GroupNorm(dim, dim, affine=False),
    so there are no gamma/beta parameters regardless of non_affine_group_norm.
    """

    def __init__(self, conv_layers, key, log_compression=False,
                 skip_connections=False, residual_scale=0.5,
                 compute_dtype=jnp.bfloat16, time_tile=None, lane_pad=LANE):
        self.log_compression = log_compression
        self.skip_connections = skip_connections
        self.residual_scale = math.sqrt(residual_scale)
        self.compute_dtype = compute_dtype

        vmem_cap = _tpu_vmem_capacity()
        self.vmem_limit = min(vmem_cap * 3 // 4, 100 * 1024 * 1024)
        self.pass2_budget = max(self.vmem_limit // 3, 8 * 1024 * 1024)
        if time_tile is None:   # bigger tiles on 128 MiB parts, conservative on v7x
            time_tile = 1024 if vmem_cap >= 96 * 1024 * 1024 else 512
        assert time_tile % 8 == 0
        self.time_tile = time_tile

        self.layers = []
        self.torch_weights = []     # (w, stride) in PyTorch (C_out, C_in, k) layout
        first_stride = conv_layers[0][2]
        # Pad the (single) waveform channel so the first layer's contraction depth
        # stride*in_pad is >= 8 and its conv runs on the MXU too.
        self.in_pad0 = max(1, _cdiv(8, first_stride))
        in_d, in_pad = 1, self.in_pad0
        for (dim, k, stride) in conv_layers:
            key, sub = jax.random.split(key)
            bound = 1.0 / math.sqrt(in_d * k)           # PyTorch Conv1d default init
            w = jax.random.uniform(sub, (dim, in_d, k), jnp.float32, -bound, bound)
            self.torch_weights.append((w, stride))

            out_pad = _round_up(dim, lane_pad)
            G = _cdiv(k, stride)
            halo = 8 * _cdiv(G - 1, 8) if G > 1 else 0
            SC = stride * in_pad
            # Stride-grouped packing: w_packed[q, r*in_pad + c, o] = w[o, c, q*stride + r]
            wp = jnp.zeros((G, SC, out_pad), jnp.float32)
            for j in range(k):
                q, r = divmod(j, stride)
                wp = wp.at[q, r * in_pad:r * in_pad + in_d, :dim].set(w[:, :, j].T)
            self.layers.append(dict(
                w_packed=wp.astype(compute_dtype), stride=stride, k=k, dim=dim,
                out_pad=out_pad, G=G, halo=halo, SC=SC))
            in_d, in_pad = dim, out_pad

    # ---- padded-length / tile planning (depends on the input length) -------
    def _plan(self, T):
        n = len(self.layers)
        L = [T]
        for layer in self.layers:
            L.append((L[-1] - layer["k"]) // layer["stride"] + 1)
            assert L[-1] > 0, "input too short for this conv stack"
        plans = [None] * n
        required_next, stride_next = 0, 1
        for i in reversed(range(n)):
            layer = self.layers[i]
            L_out = L[i + 1]
            # tL must divide the halo block stride and make nT*tL divisible by the
            # NEXT layer's stride so its stride-fold is a metadata-only reshape.
            align = _lcm(8, stride_next)
            if layer["halo"]:
                align = _lcm(align, layer["halo"])
            tL = min(self.time_tile, _round_up(L_out, 8))
            tL = _round_up(max(tL, 8), align)
            nT = _cdiv(max(L_out, required_next), tL)
            plans[i] = dict(tL=tL, nT=nT, Y=nT * tL, L_out=L_out, L_in=L[i])
            required_next = (nT * tL + layer["halo"]) * layer["stride"]
            stride_next = layer["stride"]
        return plans, required_next      # required_next == padded raw-input length

    def __call__(self, x_bct):
        # x_bct: (B, C=1, T) as in PyTorch; compute in (B, T, C) internally.
        # TODO(synk): Dropout(p=0.0) is an identity; no stochastic path implemented.
        B, C_in, T = x_bct.shape
        assert C_in == 1
        n = len(self.layers)
        plans, Lp0 = self._plan(T)
        fuse_log = self.log_compression and not self.skip_connections

        # (B, C, T) -> (B, T, C); pad the tiny 1-channel waveform once to the first
        # layer's padded length / channel count.
        x = jnp.transpose(x_bct, (0, 2, 1)).astype(self.compute_dtype)
        x = jnp.pad(x, ((0, 0), (0, max(Lp0 - T, 0)), (0, self.in_pad0 - C_in)))
        x = x[:, :Lp0, :]

        cur = x
        prev_dim = C_in
        for i, (layer, plan) in enumerate(zip(self.layers, plans)):
            residual = cur
            last = (i == n - 1)
            # stride-fold: (B, Q, Cp) -> (B, Q//stride, stride*Cp); pure reshape of a
            # contiguous buffer -- no pad / slice / cast between layers.
            _, Q, Cp = cur.shape
            assert Q % layer["stride"] == 0 and layer["stride"] * Cp == layer["SC"]
            x_r = cur.reshape(B, Q // layer["stride"], layer["SC"])
            cur = conv_block(
                x_r, layer["w_packed"],
                G=layer["G"], halo=layer["halo"],
                tL=plan["tL"], nT=plan["nT"], L_out=plan["L_out"],
                out_dtype=jnp.float32 if last else self.compute_dtype,
                log_compression=(fuse_log and last),
                vmem_limit=self.vmem_limit, pass2_budget=self.pass2_budget)

            if self.skip_connections and layer["dim"] == prev_dim:
                tsz, r_tsz = plan["L_out"], plan["L_in"]
                step = r_tsz // tsz
                res = residual[:, ::step, :][:, :tsz, :]
                res = jnp.pad(res, ((0, 0), (0, plan["Y"] - tsz),
                                    (0, cur.shape[2] - res.shape[2])))
                cur = (cur + res.astype(cur.dtype)) * self.residual_scale
            prev_dim = layer["dim"]

        out = cur[:, :plans[-1]["L_out"], :self.layers[-1]["dim"]]
        if self.log_compression and not fuse_log:
            out = jnp.log(jnp.abs(out.astype(jnp.float32)) + 1.0)
        return jnp.transpose(out, (0, 2, 1)).astype(jnp.float32)   # back to (B, C, T)


# --------------------------------------------------------------------------- #
# Pure-JAX reference (mirrors the PyTorch forward, NCT layout)
# --------------------------------------------------------------------------- #
def _reference_forward(x_bct, torch_weights, log_compression, skip_connections,
                       residual_scale):
    x = x_bct.astype(jnp.float32)
    rs = math.sqrt(residual_scale)
    for w, stride in torch_weights:
        residual = x
        y = lax.conv_general_dilated(x, w, (stride,), "VALID",
                                     dimension_numbers=("NCH", "OIH", "NCH"))
        mean = jnp.mean(y, axis=2, keepdims=True)
        var = jnp.mean((y - mean) ** 2, axis=2, keepdims=True)
        y = (y - mean) * lax.rsqrt(var + EPS)
        x = jnp.maximum(y, 0.0)
        if skip_connections and x.shape[1] == residual.shape[1]:
            tsz, r_tsz = x.shape[2], residual.shape[2]
            residual = residual[..., ::r_tsz // tsz][..., :tsz]
            x = (x + residual) * rs
    if log_compression:
        x = jnp.log(jnp.abs(x) + 1.0)
    return x


if __name__ == "__main__":
    # Small configuration consistent with the module: input is a (B, 1, T) waveform.
    conv_layers = [(8, 3, 2), (16, 3, 2)]       # (dim, kernel, stride)
    B, T = 2, 64

    key = jax.random.PRNGKey(0)
    k_x, k_w = jax.random.split(key)
    x = jax.random.normal(k_x, (B, 1, T), dtype=jnp.float32)

    def check(model, *, atol, rtol, tag):
        out = jax.block_until_ready(model(x))
        ref = _reference_forward(x, model.torch_weights, model.log_compression,
                                 model.skip_connections, 0.5)
        assert out.shape == ref.shape, (tag, out.shape, ref.shape)
        err = float(jnp.max(jnp.abs(out - ref)))
        assert jnp.allclose(out, ref, atol=atol, rtol=rtol), (tag, err)

    # fp32, tiny time tile so the multi-tile / halo / boundary-masking /
    # accumulator paths are exercised (L_out = 31 and 15 -> several tiles).
    check(ConvFeatureExtractionModelPallas(conv_layers, k_w, time_tile=8,
                                           compute_dtype=jnp.float32),
          atol=5e-4, rtol=5e-3, tag="fp32")
    # bf16 matmul operands, bf16 pass-1 intermediate and inter-layer activations,
    # fp32 accumulation + norm math.
    check(ConvFeatureExtractionModelPallas(conv_layers, k_w, time_tile=8,
                                           compute_dtype=jnp.bfloat16),
          atol=1e-1, rtol=1e-1, tag="bf16")
    # fused log compression on the last layer.
    check(ConvFeatureExtractionModelPallas(conv_layers, k_w, time_tile=8,
                                           compute_dtype=jnp.float32,
                                           log_compression=True),
          atol=5e-4, rtol=5e-3, tag="fp32+log")
    # skip connections between channel-matched layers.
    check(ConvFeatureExtractionModelPallas([(8, 3, 2), (8, 3, 2)], k_w,
                                           time_tile=8,
                                           compute_dtype=jnp.float32,
                                           skip_connections=True),
          atol=5e-4, rtol=5e-3, tag="fp32+skip")
    # k <= stride layers (G == 1): no-halo kernel variant.
    check(ConvFeatureExtractionModelPallas([(8, 2, 2), (16, 4, 4)], k_w,
                                           time_tile=8,
                                           compute_dtype=jnp.float32),
          atol=5e-4, rtol=5e-3, tag="fp32+g1")
    # default (device-tuned) tile size path.
    check(ConvFeatureExtractionModelPallas(conv_layers, k_w,
                                           compute_dtype=jnp.float32),
          atol=5e-4, rtol=5e-3, tag="fp32+default_tile")

    print("KERNEL_OK")
</pallas_src>

<mosaic_0001>
module attributes {stable_mosaic.version = 11 : i64} {
  func.func @_conv_stats_kernel(%arg0: i32, %arg1: i32, %arg2: memref<1x8x8xf32, #tpu.memory_space<vmem>>, %arg3: memref<1x8x8xf32, #tpu.memory_space<vmem>>, %arg4: memref<2x8x128xf32, #tpu.memory_space<vmem>>, %arg5: memref<1x8x128xf32, #tpu.memory_space<vmem>>, %arg6: memref<1x1x128xf32, #tpu.memory_space<vmem>>, %arg7: memref<1x1x128xf32, #tpu.memory_space<vmem>>) attributes {dimension_semantics = [#tpu.dimension_semantics<parallel>, #tpu.dimension_semantics<arbitrary>], iteration_bounds = array<i64: 2, 6>, scalar_prefetch = 0 : i64, scratch_operands = 0 : i64, tpu.core_type = #tpu.core_type<tc>, window_params = [{transform_indices = @transform_0, window_bounds = array<i64: 1, 8, 8>}, {transform_indices = @transform_1, window_bounds = array<i64: 1, 8, 8>}, {pipeline_mode = #tpu.pipeline_mode<synchronous>, transform_indices = @transform_2, window_bounds = array<i64: 2, 8, 128>}, {transform_indices = @transform_3, window_bounds = array<i64: 1, 8, 128>}, {transform_indices = @transform_4, window_bounds = array<i64: 1, 1, 128>}, {transform_indices = @transform_5, window_bounds = array<i64: 1, 1, 128>}]} {
    %c0 = arith.constant 0 : index
    %c0_0 = arith.constant 0 : index
    %c0_1 = arith.constant 0 : index
    %0 = vector.load %arg2[%c0, %c0_0, %c0_1] : memref<1x8x8xf32, #tpu.memory_space<vmem>>, vector<1x8x8xf32>
    %1 = vector.shape_cast %0 : vector<1x8x8xf32> to vector<8x8xf32>
    %c0_2 = arith.constant 0 : index
    %c0_3 = arith.constant 0 : index
    %c0_4 = arith.constant 0 : index
    %2 = vector.load %arg4[%c0_2, %c0_3, %c0_4] : memref<2x8x128xf32, #tpu.memory_space<vmem>>, vector<1x8x128xf32>
    %3 = vector.shape_cast %2 : vector<1x8x128xf32> to vector<8x128xf32>
    %cst = arith.constant dense<0.000000e+00> : vector<8x128xf32>
    %4 = tpu.matmul %1, %3, %cst {dimension_numbers = #tpu.dot_dimension_numbers<[1], [0], [0], [1], [0, 0, 1, 1], [], []>} : vector<8x8xf32>, vector<8x128xf32>, vector<8x128xf32> -> vector<8x128xf32>
    %c0_5 = arith.constant 0 : index
    %c0_6 = arith.constant 0 : index
    %c0_7 = arith.constant 0 : index
    %5 = vector.load %arg3[%c0_5, %c0_6, %c0_7] : memref<1x8x8xf32, #tpu.memory_space<vmem>>, vector<1x8x8xf32>
    %6 = vector.shape_cast %5 : vector<1x8x8xf32> to vector<8x8xf32>
    %7 = tpu.concatenate %1, %6 in 0 : vector<8x8xf32>, vector<8x8xf32> -> vector<16x8xf32>
    %8 = vector.extract_strided_slice %7 {offsets = [1, 0], sizes = [8, 8], strides = [1, 1]} : vector<16x8xf32> to vector<8x8xf32>
    %c1 = arith.constant 1 : index
    %c0_8 = arith.constant 0 : index
    %c0_9 = arith.constant 0 : index
    %9 = vector.load %arg4[%c1, %c0_8, %c0_9] : memref<2x8x128xf32, #tpu.memory_space<vmem>>, vector<1x8x128xf32>
    %10 = vector.shape_cast %9 : vector<1x8x128xf32> to vector<8x128xf32>
    %cst_10 = arith.constant dense<0.000000e+00> : vector<8x128xf32>
    %11 = tpu.matmul %8, %10, %cst_10 {dimension_numbers = #tpu.dot_dimension_numbers<[1], [0], [0], [1], [0, 0, 1, 1], [], []>} : vector<8x8xf32>, vector<8x128xf32>, vector<8x128xf32> -> vector<8x128xf32>
    %12 = arith.addf %4, %11 : vector<8x128xf32>
    %c0_11 = arith.constant 0 : index
    %c0_12 = arith.constant 0 : index
    %c0_13 = arith.constant 0 : index
    %13 = vector.load %arg5[%c0_11, %c0_12, %c0_13] : memref<1x8x128xf32, #tpu.memory_space<vmem>>, vector<1x8x128xf32>
    %14 = vector.shape_cast %13 : vector<1x8x128xf32> to vector<8x128xf32>
    %15 = vector.shape_cast %12 : vector<8x128xf32> to vector<1x8x128xf32>
    tpu.vector_store %arg5[%c0_11, %c0_12, %c0_13], %15 {strides = array<i32>} : memref<1x8x128xf32, #tpu.memory_space<vmem>>, vector<1x8x128xf32>,
    %c0_i32 = arith.constant 0 : i32
    %16 = arith.cmpi eq, %arg1, %c0_i32 : i32
    %17 = arith.extui %16 : i1 to i32
    %c0_i32_14 = arith.constant 0 : i32
    %18 = arith.cmpi ne, %17, %c0_i32_14 : i32
    scf.if %18 {
      %cst_18 = arith.constant 0.000000e+00 : f32
      %25 = vector.broadcast %cst_18 : f32 to vector<1x1x128xf32>
      %c0_19 = arith.constant 0 : index
      %c0_20 = arith.constant 0 : index
      %c0_21 = arith.constant 0 : index
      %26 = vector.load %arg6[%c0_19, %c0_20, %c0_21] : memref<1x1x128xf32, #tpu.memory_space<vmem>>, vector<1x1x128xf32>
      tpu.vector_store %arg6[%c0_19, %c0_20, %c0_21], %25 {strides = array<i32>} : memref<1x1x128xf32, #tpu.memory_space<vmem>>, vector<1x1x128xf32>,
      %cst_22 = arith.constant 0.000000e+00 : f32
      %27 = vector.broadcast %cst_22 : f32 to vector<1x1x128xf32>
      %c0_23 = arith.constant 0 : index
      %c0_24 = arith.constant 0 : index
      %c0_25 = arith.constant 0 : index
      %28 = vector.load %arg7[%c0_23, %c0_24, %c0_25] : memref<1x1x128xf32, #tpu.memory_space<vmem>>, vector<1x1x128xf32>
      tpu.vector_store %arg7[%c0_23, %c0_24, %c0_25], %27 {strides = array<i32>} : memref<1x1x128xf32, #tpu.memory_space<vmem>>, vector<1x1x128xf32>,
    } else {
    }
    %c3_i32 = arith.constant 3 : i32
    %19 = arith.cmpi slt, %arg1, %c3_i32 : i32
    %20 = arith.extui %19 : i1 to i32
    %c0_i32_15 = arith.constant 0 : i32
    %21 = arith.cmpi ne, %20, %c0_i32_15 : i32
    scf.if %21 {
      %c0_18 = arith.constant 0 : index
      %c0_19 = arith.constant 0 : index
      %c0_20 = arith.constant 0 : index
      %25 = vector.load %arg6[%c0_18, %c0_19, %c0_20] : memref<1x1x128xf32, #tpu.memory_space<vmem>>, vector<1x1x128xf32>
      %26 = vector.shape_cast %25 : vector<1x1x128xf32> to vector<1x128xf32>
      %cst_21 = arith.constant dense<0.000000e+00> : vector<128xf32>
      %27 = vector.multi_reduction <add>, %12, %cst_21 [0] : vector<8x128xf32> to vector<128xf32>
      %28 = vector.shape_cast %27 : vector<128xf32> to vector<1x128xf32>
      %29 = arith.addf %26, %28 : vector<1x128xf32>
      %c0_22 = arith.constant 0 : index
      %c0_23 = arith.constant 0 : index
      %c0_24 = arith.constant 0 : index
      %30 = vector.load %arg6[%c0_22, %c0_23, %c0_24] : memref<1x1x128xf32, #tpu.memory_space<vmem>>, vector<1x1x128xf32>
      %31 = vector.shape_cast %30 : vector<1x1x128xf32> to vector<1x128xf32>
      %32 = vector.shape_cast %29 : vector<1x128xf32> to vector<1x1x128xf32>
      tpu.vector_store %arg6[%c0_22, %c0_23, %c0_24], %32 {strides = array<i32>} : memref<1x1x128xf32, #tpu.memory_space<vmem>>, vector<1x1x128xf32>,
      %c0_25 = arith.constant 0 : index
      %c0_26 = arith.constant 0 : index
      %c0_27 = arith.constant 0 : index
      %33 = vector.load %arg7[%c0_25, %c0_26, %c0_27] : memref<1x1x128xf32, #tpu.memory_space<vmem>>, vector<1x1x128xf32>
      %34 = vector.shape_cast %33 : vector<1x1x128xf32> to vector<1x128xf32>
      %35 = arith.mulf %12, %12 : vector<8x128xf32>
      %cst_28 = arith.constant dense<0.000000e+00> : vector<128xf32>
      %36 = vector.multi_reduction <add>, %35, %cst_28 [0] : vector<8x128xf32> to vector<128xf32>
      %37 = vector.shape_cast %36 : vector<128xf32> to vector<1x128xf32>
      %38 = arith.addf %34, %37 : vector<1x128xf32>
      %c0_29 = arith.constant 0 : index
      %c0_30 = arith.constant 0 : index
      %c0_31 = arith.constant 0 : index
      %39 = vector.load %arg7[%c0_29, %c0_30, %c0_31] : memref<1x1x128xf32, #tpu.memory_space<vmem>>, vector<1x1x128xf32>
      %40 = vector.shape_cast %39 : vector<1x1x128xf32> to vector<1x128xf32>
      %41 = vector.shape_cast %38 : vector<1x128xf32> to vector<1x1x128xf32>
      tpu.vector_store %arg7[%c0_29, %c0_30, %c0_31], %41 {strides = array<i32>} : memref<1x1x128xf32, #tpu.memory_space<vmem>>, vector<1x1x128xf32>,
    } else {
    }
    %c3_i32_16 = arith.constant 3 : i32
    %22 = arith.cmpi eq, %arg1, %c3_i32_16 : i32
    %23 = arith.extui %22 : i1 to i32
    %c0_i32_17 = arith.constant 0 : i32
    %24 = arith.cmpi ne, %23, %c0_i32_17 : i32
    scf.if %24 {
      %c8_i32 = arith.constant 8 : i32
      %25 = arith.muli %arg1, %c8_i32 : i32
      %26 = tpu.iota {dimensions = array<i32: 0>} : vector<8x1xi32>
      %27 = vector.broadcast %25 : i32 to vector<8x1xi32>
      %28 = arith.addi %27, %26 : vector<8x1xi32>
      %c31_i32 = arith.constant 31 : i32
      %29 = vector.broadcast %c31_i32 : i32 to vector<8x1xi32>
      %30 = arith.cmpi slt, %28, %29 : vector<8x1xi32>
      %cst_18 = arith.constant 0.000000e+00 : f32
      %31 = vector.shape_cast %30 : vector<8x1xi1> to vector<8x1xi1>
      %32 = vector.broadcast %31 : vector<8x1xi1> to vector<8x128xi1>
      %33 = vector.broadcast %cst_18 : f32 to vector<8x128xf32>
      %34 = arith.select %32, %12, %33 : vector<8x128xi1>, vector<8x128xf32>
      %c0_19 = arith.constant 0 : index
      %c0_20 = arith.constant 0 : index
      %c0_21 = arith.constant 0 : index
      %35 = vector.load %arg6[%c0_19, %c0_20, %c0_21] : memref<1x1x128xf32, #tpu.memory_space<vmem>>, vector<1x1x128xf32>
      %36 = vector.shape_cast %35 : vector<1x1x128xf32> to vector<1x128xf32>
      %cst_22 = arith.constant dense<0.000000e+00> : vector<128xf32>
      %37 = vector.multi_reduction <add>, %34, %cst_22 [0] : vector<8x128xf32> to vector<128xf32>
      %38 = vector.shape_cast %37 : vector<128xf32> to vector<1x128xf32>
      %39 = arith.addf %36, %38 : vector<1x128xf32>
      %c0_23 = arith.constant 0 : index
      %c0_24 = arith.constant 0 : index
      %c0_25 = arith.constant 0 : index
      %40 = vector.load %arg6[%c0_23, %c0_24, %c0_25] : memref<1x1x128xf32, #tpu.memory_space<vmem>>, vector<1x1x128xf32>
      %41 = vector.shape_cast %40 : vector<1x1x128xf32> to vector<1x128xf32>
      %42 = vector.shape_cast %39 : vector<1x128xf32> to vector<1x1x128xf32>
      tpu.vector_store %arg6[%c0_23, %c0_24, %c0_25], %42 {strides = array<i32>} : memref<1x1x128xf32, #tpu.memory_space<vmem>>, vector<1x1x128xf32>,
      %c0_26 = arith.constant 0 : index
      %c0_27 = arith.constant 0 : index
      %c0_28 = arith.constant 0 : index
      %43 = vector.load %arg7[%c0_26, %c0_27, %c0_28] : memref<1x1x128xf32, #tpu.memory_space<vmem>>, vector<1x1x128xf32>
      %44 = vector.shape_cast %43 : vector<1x1x128xf32> to vector<1x128xf32>
      %45 = arith.mulf %34, %34 : vector<8x128xf32>
      %cst_29 = arith.constant dense<0.000000e+00> : vector<128xf32>
      %46 = vector.multi_reduction <add>, %45, %cst_29 [0] : vector<8x128xf32> to vector<128xf32>
      %47 = vector.shape_cast %46 : vector<128xf32> to vector<1x128xf32>
      %48 = arith.addf %44, %47 : vector<1x128xf32>
      %c0_30 = arith.constant 0 : index
      %c0_31 = arith.constant 0 : index
      %c0_32 = arith.constant 0 : index
      %49 = vector.load %arg7[%c0_30, %c0_31, %c0_32] : memref<1x1x128xf32, #tpu.memory_space<vmem>>, vector<1x1x128xf32>
      %50 = vector.shape_cast %49 : vector<1x1x128xf32> to vector<1x128xf32>
      %51 = vector.shape_cast %48 : vector<1x128xf32> to vector<1x1x128xf32>
      tpu.vector_store %arg7[%c0_30, %c0_31, %c0_32], %51 {strides = array<i32>} : memref<1x1x128xf32, #tpu.memory_space<vmem>>, vector<1x1x128xf32>,
    } else {
    }
    return
  }
  func.func @transform_0(%arg0: i32, %arg1: i32) -> (i32, i32, i32) {
    %c0_i32 = arith.constant 0 : i32
    %c0_i32_0 = arith.constant 0 : i32
    return %arg0, %arg1, %c0_i32 : i32, i32, i32
  }
  func.func @transform_1(%arg0: i32, %arg1: i32) -> (i32, i32, i32) {
    %c1_i32 = arith.constant 1 : i32
    %0 = arith.addi %arg1, %c1_i32 : i32
    %c1_i32_0 = arith.constant 1 : i32
    %1 = arith.muli %0, %c1_i32_0 : i32
    %c0_i32 = arith.constant 0 : i32
    %c0_i32_1 = arith.constant 0 : i32
    return %arg0, %1, %c0_i32 : i32, i32, i32
  }
  func.func @transform_2(%arg0: i32, %arg1: i32) -> (i32, i32, i32) {
    %c0_i32 = arith.constant 0 : i32
    %c0_i32_0 = arith.constant 0 : i32
    %c0_i32_1 = arith.constant 0 : i32
    %c0_i32_2 = arith.constant 0 : i32
    return %c0_i32, %c0_i32_0, %c0_i32_1 : i32, i32, i32
  }
  func.func @transform_3(%arg0: i32, %arg1: i32) -> (i32, i32, i32) {
    %c0_i32 = arith.constant 0 : i32
    %c0_i32_0 = arith.constant 0 : i32
    return %arg0, %arg1, %c0_i32 : i32, i32, i32
  }
  func.func @transform_4(%arg0: i32, %arg1: i32) -> (i32, i32, i32) {
    %c0_i32 = arith.constant 0 : i32
    %c0_i32_0 = arith.constant 0 : i32
    %c0_i32_1 = arith.constant 0 : i32
    return %arg0, %c0_i32, %c0_i32_0 : i32, i32, i32
  }
  func.func @transform_5(%arg0: i32, %arg1: i32) -> (i32, i32, i32) {
    %c0_i32 = arith.constant 0 : i32
    %c0_i32_0 = arith.constant 0 : i32
    %c0_i32_1 = arith.constant 0 : i32
    return %arg0, %c0_i32, %c0_i32_0 : i32, i32, i32
  }
}

</mosaic_0001>

<bundles_post_ra>
// kernel: tpu_custom_call.1
= control target key start
LH: loop header
LB: loop body
LE: loop exit
PB: predicated region body
PF: predicated region fallthrough
CT: control target
= control target key end

     0   :  { %s1394_s0 = inlined_call_operand.vmem [shape: f32[2,56,8], index: 0, kind: input, shape index: {}]   ;;  %s1395_s1 = inlined_call_operand.vmem [shape: f32[2,56,8], index: 1, kind: input, shape index: {}]   ;;  %s1396_s2 = inlined_call_operand.vmem [shape: f32[2,8,128], index: 2, kind: input, shape index: {}]   ;;  %s1397_s3 = inlined_call_operand.hbm [shape: f32[2,48,128], index: 3, kind: output, shape index: {0}]   ;;  %s1398_s4 = inlined_call_operand.hbm [shape: f32[2,1,128], index: 4, kind: output, shape index: {1}]   ;;  %s1399_s5 = inlined_call_operand.hbm [shape: f32[2,1,128], index: 5, kind: output, shape index: {2}]  }
   0x1   :  { %1410 = sst [smem:[#allocation15_spill]] %s1394_s0 }
   0x2   :  { %1411 = sst [smem:[#allocation16_spill]] %s1395_s1 }
   0x3   :  { %1412 = sst [smem:[#allocation17_spill]] %s1396_s2 }
   0x4   :  { %1413 = sst [smem:[#allocation18_spill]] %s1398_s4 }
   0x5   :  { %11 = vsyncpa [#allocation3], 0 }
   0x6   :  { %13 = vsyncpa [#allocation3 + $0x1], 0 }
   0x7   :  { %14 = vsyncpa [#allocation5], 0 }
   0x8   :  { %16 = vsyncpa [#allocation5 + $0x1], 0  ;;  %s1081_s18 = smov 0   ;;  %s1083_s19 = smov 0  }
   0x9   :  { %s1085_s20 = smov 0   ;;  %s1087_s21 = smov 0  }
   0xa   :  { %s1089_s22 = smov 0   ;;  %s1091_s23 = smov 0  }
   0xb   :  { %s1093_s24 = smov 0   ;;  %s1095_s25 = smov 0  }
   0xc   :  { %s1097_s26 = smov 0   ;;  %s1099_s27 = smov 0  }
   0xd   :  { %s1101_s28 = smov 0  }
   0xe LB: > { %1414 = sst [smem:[#allocation9_spill]] %s1023_s23  ;;  %s1401_s29 = sadd.s32 4294967295, %s1043_s28   ;;  %s1043_s28 = sphi %s1101_s28, %s22_s28   ;;  %s1039_s27 = sphi %s1099_s27, %s1442_s27   ;;  %s1035_s26 = sphi %s1097_s26, %s1441_s26   ;;  %s1031_s25 = sphi %s1095_s25, %s1440_s25   ;;  %s1027_s24 = sphi %s1093_s24, %s1439_s24   ;;  %s1023_s23 = sphi %s1091_s23, %s1438_s23   ;;  %s1019_s22 = sphi %s1089_s22, %s1447_s22   ;;  %s1015_s21 = sphi %s1087_s21, %s1446_s21   ;;  %s1011_s20 = sphi %s1085_s20, %s1445_s20   ;;  %s1007_s19 = sphi %s1083_s19, %s1444_s19   ;;  %s1003_s18 = sphi %s1081_s18, %s1443_s18  }
   0xf   : > { %1415 = sst [smem:[#allocation10_spill]] %s1035_s26  ;;  %s1400_s30 = sadd.s32 4294967294, %s1043_s28  }
  0x10   : > { %1416 = sst [smem:[#allocation11_spill]] %s1039_s27  ;;  %s31_s6 = sadd.s32 1, %s1035_s26 }
  0x11   : > { %s34_s7 = sadd.s32 1, %s1039_s27  ;;  %p32_p0 = scmp.ge.s32.totalorder %s31_s6, 6 }
  0x12   : > { %s122_s8 = sadd.s32 1, %s1023_s23  ;;  %p132_p1 = scmp.ne.s32.totalorder %s1023_s23, %s1019_s22 }
  0x13   : > { %p1145_p2 = scmp.eq.s32.totalorder %s1401_s29, 11  ;;  %s1449_s6 = smov (%p32_p0, %s31_s6), 0 }
  0x14   : > { %1418 = sst [smem:[#allocation12_spill]] %s1449_s6  ;;  %s1451_s7 = smov (!%p32_p0, %s34_s7), %s1039_s27 }
  0x15   : > { %s118_s10 = ssub.s32 %s1035_s26, %s1449_s6  ;;  %p1156_p3 = por %p1145_p2, %p132_p1 }
  0x16   : > { %p36_p4 = scmp.ge.s32.totalorder %s1451_s7, 2  ;;  %p138_p5 = scmp.ne.s32.totalorder %s1019_s22, %s1015_s21 }
  0x17   : > { %p1164_p6 = scmp.eq.s32.totalorder %s1400_s30, 11  ;;  %s148_s13 = sadd.s32 1, %s1011_s20 }
  0x18   : > { %s1453_s7 = smov (%p36_p4, %s1451_s7), 0  ;;  %p158_p8 = scmp.ne.s32.totalorder %s1011_s20, %s1007_s19 }
  0x19   : > { %1421 = sst [smem:[#allocation13_spill]] %s1453_s7  ;;  %p1173_p7 = por %p1164_p6, %p138_p5 }
  0x1a   : > { %s117_s15 = ssub.s32 %s1039_s27, %s1453_s7  ;;  %p164_p9 = scmp.ne.s32.totalorder %s1007_s19, %s1003_s18 }
  0x1b   : > { %s119_s16 = sor.u32 %s118_s10, %s117_s15  ;;  %p146_p10 = scmp.eq.s32.totalorder %s117_s15, 0 }
  0x1c   : > { %p120_p11 = scmp.eq.s32.totalorder %s119_s16, 0  ;;  %p1185_p12 = por %p158_p8, %p1145_p2 }
  0x1d   : > { %s1190_s30 = scalar_select %p146_p10, %s1011_s20, %s148_s13  }
  0x1e   : > { %s1193_s29 = scalar_select %p120_p11, %s1023_s23, %s122_s8  }
  0x1f   : > { %p1197_p13 = por %p164_p9, %p1164_p6  ;;  %p723_p0 = scmp.ge.s32.totalorder %s1043_s28, 1 }
  0x20   : > { %1424 = sst [smem:[#allocation14_spill]] %s1193_s29  ;;  %p236_p1 = scmp.lt.s32.totalorder %s1043_s28, 13 }
  0x22   : > { %p237_p4 = pnand %p723_p0, %p236_p1 }
  0x23   : > { %s1426_s2 = sld [smem:[#allocation17_spill]] (!%p237_p4)  ;;  %p284_p2 = scmp.lt.s32.totalorder (!%p237_p4), %s1031_s25, 1  ;;  %v1045_v2 = vmov (!%p237_p4), 0.0   ;;  %vm1046_vm0 = vmmov (!%p237_p4), 0   ;;  %vm313_vm1 = vcmask (!%p237_p4), 64512   ;;  %vm309_vm2 = vcmask (!%p237_p4), 1046528  }
  0x24   : > { %240 = sbr.rel (%p237_p4) target bundleno = 391 (0x187), region = 32  ;;  %749 = vmatprep.subr.mxu0 (!%p237_p4), %v1045_v2  ;;  %744 = vmatprep.subr.mxu1 (!%p237_p4), %v1045_v2  ;;  %p286_p5 = scmp.lt.s32.totalorder (!%p237_p4), %s1027_s24, 6 }
  0x25   : > { %751 = vmatprep.mubr.msk.f32.mxu0 (!%p237_p4), %vm1046_vm0, %v1045_v2  ;;  %746 = vmatprep.mubr.msk.f32.mxu1 (!%p237_p4), %vm1046_vm0, %v1045_v2  ;;  %s292_s15 = sadd.s32 (!%p237_p4), 1, %s1027_s24  ;;  %s1427_s0 = sld [smem:[#allocation15_spill]] (!%p237_p4) }
  0x26   : > { %p295_p6 = scmp.lt.s32.totalorder (!%p237_p4), %s292_s15, 6  ;;  %s1428_s1 = sld [smem:[#allocation16_spill]] (!%p237_p4) }
  0x27   : > { %p730_p8 = scmp.ne.s32.totalorder (!%p237_p4), %s1027_s24, 0 }
  0x29   : > { %v303_v0 = vld [vmem:[%s1426_s2] sm:$0xff] (!%p237_p4)  ;;  %v727_v1 = vld [vmem:[%s1426_s2 + $0x8] sm:$0xff] (!%p237_p4) }
  0x2a   : > { %750 = vmatpush3.msra.mxu0 (!%p237_p4), %v303_v0  ;;  %745 = vmatpush3.msra.mxu1 (!%p237_p4), %v727_v1 }
  0x2b   : > { %s285_s13 = scalar_select %p284_p2, %s1031_s25, 1 }
  0x2c   : > { %s287_s9 = scalar_select %p286_p5, %s1027_s24, 6 }
  0x2d   : > { %s755_s16 = smul.u32 7, %s285_s13  ;;  %s1455_s15 = smov (!%p295_p6, %s292_s15), 6  ;;  %v1047_v13 = vmov (!%p730_p8), 0.0  }
  0x2e   : > { %s1407_s13 = sand.u32 1, %s1019_s22  }
  0x2f   : > { %s289_s10 = sadd.s32 %s755_s16, %s287_s9  ;;  %s298_s12 = sadd.s32 %s755_s16, %s1455_s15 }
  0x30   : > { %s725_s8 = sshll.u32 %s289_s10, 3  ;;  %s726_s27 = sshll.u32 %s298_s12, 3 }
  0x31   : > { %s291_s7 = scalar_lea.vmem %s1427_s0, %s725_s8  ;;  %s300_s23 = scalar_lea.vmem %s1428_s1, %s726_s27 }
  0x32   : > { %v302_v3 = vld [vmem:[%s291_s7] sm:$0xff]  ;;  %s1224_s2 = sshll.u32 %s1407_s13, 3  ;;  %s1429_s27 = sand.u32 1, %s1007_s19  }
  0x33   : > { %v310_v4 = vrot.slane %v302_v3, 1  ;;  %752 = vmatmul.mubr.msk.f32.vlgmr.msra.gmra.mrb[0].mxu0 %vm313_vm1, %v302_v3  ;;  %v304_v5 = vld [vmem:[%s300_s23] sm:$0xff]  ;;  %s1408_s26 = scalar_lea.vmem [#allocation2], %s1224_s2  ;;  %s1231_s23 = scalar_lea.vmem [#allocation4], %s1429_s27 }
  0x34   : > { %v311_v6 = vrot.slane %v304_v5, 1  ;;  %s1430_s29 = smov %s1429_s27  ;;  %463 = vst [vmem:[%s1231_s23] sm:$0x1] (!%p730_p8), %v1047_v13 }
  0x35   : > { %s1235_s7 = scalar_lea.vmem [#allocation6], %s1430_s29 }
  0x36   : > { %v312_v7 = vsel %vm309_vm2, %v310_v4, %v311_v6  ;;  %464 = vst [vmem:[%s1235_s7] sm:$0x1] (!%p730_p8), %v1047_v13 }
  0x37   : > { %747 = vmatmul.mubr.msk.f32.vlgmr.msra.gmra.mrb[0].mxu1 %vm313_vm1, %v312_v7 }
 0x106   : > { %v454_v8 = vpop.f32.mrb[0].mxu0 }
 0x107   : > { %v753_v9 = vpop.f32.mrb[1].mxu0  ;;  %462 = sbr.rel (%p730_p8) target bundleno = 270 (0x10e), region = 36 }
 0x10a   : > { %v382_v10 = vpop.f32.mrb[0].mxu1 }
 0x10b   : > { %v455_v11 = vadd.f32 %v454_v8, %v382_v10  ;;  %v748_v12 = vpop.f32.mrb[1].mxu1 }
 0x10d   : > { %458 = vst [vmem:[%s1408_s26] sm:$0xff] %v455_v11 }
 0x10e PF: > { %p731_p9 = scmp.ge.s32.totalorder %s1027_s24, 3 }
 0x10f   : > { %v470_v14 = vrot.slane (!%p731_p9), %v455_v11, 4  ;;  %v479_v15 = vmul.f32 (!%p731_p9), %v455_v11, %v455_v11  ;;  %v469_v24 = vld [vmem:[%s1231_s23] sm:$0x1] (!%p731_p9) }
 0x110   : > { %468 = sbr.rel (%p731_p9) target bundleno = 288 (0x120), region = 40  ;;  %v478_v27 = vld [vmem:[%s1235_s7] sm:$0x1] (!%p731_p9) }
 0x111   : > { %v471_v16 = vadd.f32 (!%p731_p9), %v470_v14, %v455_v11  ;;  %v480_v17 = vrot.slane (!%p731_p9), %v479_v15, 4 }
 0x113   : > { %v472_v18 = vrot.slane (!%p731_p9), %v471_v16, 2  ;;  %v481_v19 = vadd.f32 (!%p731_p9), %v480_v17, %v479_v15 }
 0x115   : > { %v473_v20 = vadd.f32 (!%p731_p9), %v472_v18, %v471_v16  ;;  %v482_v21 = vrot.slane (!%p731_p9), %v481_v19, 2 }
 0x117   : > { %v474_v22 = vrot.slane %v473_v20, 1  ;;  %v483_v23 = vadd.f32 %v482_v21, %v481_v19 }
 0x119   : > { %v475_v25 = vadd.f32 %v474_v22, %v473_v20  ;;  %v484_v26 = vrot.slane %v483_v23, 1 }
 0x11b   : > { %v476_v28 = vadd.f32 %v475_v25, %v469_v24  ;;  %v485_v29 = vadd.f32 %v484_v26, %v483_v23 }
 0x11d   : > { %477 = vst [vmem:[%s1231_s23] sm:$0x1] %v476_v28  ;;  %v486_v30 = vadd.f32 %v485_v29, %v478_v27 }
 0x11f   : > { %487 = vst [vmem:[%s1235_s7] sm:$0x1] %v486_v30 }
 0x120 PF: > { %p732_p10 = scmp.ne.s32.totalorder %s1027_s24, 3 }
 0x121   : > { %s733_s18 = sshll.u32 (!%p732_p10), %s1027_s24, 3  ;;  %v493_v31 = vlaneseq (!%p732_p10) }
 0x122   : > { %491 = sbr.rel (%p732_p10) target bundleno = 314 (0x13a), region = 44  ;;  %v495_v32 = vstv (!%p732_p10), %s733_s18 }
 0x123   : > { %v494_v33 = vshrl.u32 (!%p732_p10), %v493_v31, 7 }
 0x124   : > { %v501_v46 = vld [vmem:[%s1231_s23] sm:$0x1] (!%p732_p10) }
 0x125   : > { %v496_v34 = vadd.s32 (!%p732_p10), %v495_v32, %v494_v33 }
 0x126   : > { %v510_v49 = vld [vmem:[%s1235_s7] sm:$0x1] (!%p732_p10) }
 0x127   : > { %vm497_vm3 = vcmp.lt.s32.totalorder (!%p732_p10), %v496_v34, 31 }
 0x128   : > { %v500_v35 = vsel (!%p732_p10), %vm497_vm3, %v455_v11, 0.0 }
 0x129   : > { %v502_v36 = vrot.slane %v500_v35, 4  ;;  %v511_v37 = vmul.f32 %v500_v35, %v500_v35 }
 0x12b   : > { %v503_v38 = vadd.f32 %v502_v36, %v500_v35  ;;  %v512_v39 = vrot.slane %v511_v37, 4 }
 0x12d   : > { %v504_v40 = vrot.slane %v503_v38, 2  ;;  %v513_v41 = vadd.f32 %v512_v39, %v511_v37 }
 0x12f   : > { %v505_v42 = vadd.f32 %v504_v40, %v503_v38  ;;  %v514_v43 = vrot.slane %v513_v41, 2 }
 0x131   : > { %v506_v44 = vrot.slane %v505_v42, 1  ;;  %v515_v45 = vadd.f32 %v514_v43, %v513_v41 }
 0x133   : > { %v507_v47 = vadd.f32 %v506_v44, %v505_v42  ;;  %v516_v48 = vrot.slane %v515_v45, 1 }
 0x135   : > { %v508_v50 = vadd.f32 %v507_v47, %v501_v46  ;;  %v517_v51 = vadd.f32 %v516_v48, %v515_v45 }
 0x137   : > { %509 = vst [vmem:[%s1231_s23] sm:$0x1] %v508_v50  ;;  %v518_v52 = vadd.f32 %v517_v51, %v510_v49 }
 0x139   : > { %519 = vst [vmem:[%s1235_s7] sm:$0x1] %v518_v52 }
 0x13a PF: > { %s1431_s15 = sadd.s32 4294967295, %s1043_s28   ;;  %s1409_s9 = sshll.u32 %s1031_s25, 4 }
 0x13b   : > { %s1253_s16 = sand.u32 1, %s1431_s15   ;;  %s1432_s4 = sld [smem:[#allocation18_spill]] }
 0x13c   : > { %s557_s27 = sshll.u32 %s1231_s23, 4  ;;  %s756_s29 = smul.u32 6, %s1031_s25  ;;  %s1264_s27 = int_to_ptr.vmem [resolvable:$true] %s557_s27 }
 0x13d   : > { %s526_s18 = scalar_lea.sflag [#allocation5], %s1253_s16  ;;  %s865_s13 = scalar_lea.vmem %s1264_s27, 16 }
 0x13e   : > { %p866_p11 = scmp.ne.s32.totalorder %s1264_s27, %s865_s13  ;;  %s1048_s15 = smov [#allocation4]  }
 0x13f   : > { %s869_s26 = sshll.u32 %s1048_s15, 4  ;;  %s870_s26 = int_to_ptr.vmem [resolvable:$false] %s869_s26 }
 0x140   : > { %p867_p0 = pnand %p866_p11, %p1185_p12  ;;  %s871_s0 = scalar_lea.vmem %s870_s26, 32 }
 0x141   : > { %s1261_s12 = scalar_lea.hbm %s1432_s4, %s1409_s9  ;;  %p872_p4 = scmp.lt.s32.totalorder %s1264_s27, %s870_s26 }
 0x142   : > { %p868_p1 = pneg %p867_p0  ;;  %p873_p2 = scmp.lt.s32.totalorder %s871_s0, %s865_s13 }
 0x144   : > { %p874_p5 = por %p873_p2, %p872_p4 }
 0x146   : > { %p875_p6 = pnand %p874_p5, %p868_p1 }
 0x148   : > { %878 = shalt.err (!%p875_p6)
}
 0x149   : > { %s879_s23 = scalar_lea.hbm %s1261_s12, 16  ;;  %s883_s15 = scalar_lea.hbm %s1432_s4, 32 }
 0x14a   : > { %p880_p8 = scmp.ne.s32.totalorder %s1261_s12, %s879_s23  ;;  %p884_p11 = scmp.lt.u32.totalorder %s1261_s12, %s1432_s4 }
 0x14b   : > { %p885_p0 = scmp.lt.u32.totalorder %s883_s15, %s879_s23  ;;  %p887_p4 = scmp.lt.u32.totalorder %s879_s23, %s1261_s12 }
 0x14c   : > { %p881_p9 = pnand %p880_p8, %p1185_p12 }
 0x14d   : > { %p886_p1 = por %p885_p0, %p884_p11 }
 0x14e   : > { %p882_p10 = pneg %p881_p9 }
 0x14f   : > { %p888_p2 = por %p887_p4, %p886_p1 }
 0x151   : > { %p889_p5 = pnand %p888_p2, %p882_p10 }
 0x153   : > { %892 = shalt.err (!%p889_p5)
}
 0x154   : > { %758 = dma.vmem_to_hbm [thread:$0]  (%p1185_p12), %s1264_s27, 16, %s1261_s12, %s526_s18  }
 0x155   : > { %s540_s0 = sadd.s32 %s1027_s24, %s756_s29  ;;  %s1433_s13 = scalar_lea.vmem [#allocation2], %s1224_s2 }
 0x156   : > { %s544_s9 = sshll.u32 %s1433_s13, 4  ;;  %s735_s23 = sshll.u32 %s540_s0, 7  ;;  %s1296_s9 = int_to_ptr.vmem [resolvable:$true] %s544_s9 }
 0x157   : > { %s1301_s15 = scalar_lea.hbm %s1397_s3, %s735_s23  ;;  %s1434_s26 = sshll.u32 %s1031_s25, 4 }
 0x158   : > { %s1308_s12 = scalar_lea.hbm %s1399_s5, %s1434_s26  ;;  %s1435_s24 = sand.u32 1, %s1019_s22  }
 0x159   : > { %s521_s2 = scalar_lea.sflag [#allocation3], %s1435_s24  ;;  %s893_s27 = scalar_lea.vmem %s1296_s9, 128 }
 0x15a   : > { %p894_p6 = scmp.ne.s32.totalorder %s1296_s9, %s893_s27  ;;  %s1049_s29 = smov [#allocation2]  }
 0x15b   : > { %s897_s0 = sshll.u32 %s1049_s29, 4  ;;  %s898_s0 = int_to_ptr.vmem [resolvable:$false] %s897_s0 }
 0x15c   : > { %p895_p8 = pnand %p894_p6, %p1156_p3  ;;  %s899_s13 = scalar_lea.vmem %s898_s0, 256 }
 0x15d   : > { %p900_p10 = scmp.lt.s32.totalorder %s1296_s9, %s898_s0  ;;  %p901_p11 = scmp.lt.s32.totalorder %s899_s13, %s893_s27 }
 0x15e   : > { %p896_p9 = pneg %p895_p8 }
 0x15f   : > { %p902_p0 = por %p901_p11, %p900_p10 }
 0x161   : > { %p903_p1 = pnand %p902_p0, %p896_p9 }
 0x163   : > { %906 = shalt.err (!%p903_p1)
}
 0x164   : > { %s907_s1 = scalar_lea.hbm %s1301_s15, 128  ;;  %s911_s23 = scalar_lea.hbm %s1397_s3, 1536 }
 0x165   : > { %p908_p4 = scmp.ne.s32.totalorder %s1301_s15, %s907_s1  ;;  %p912_p6 = scmp.lt.u32.totalorder %s1301_s15, %s1397_s3 }
 0x166   : > { %p913_p8 = scmp.lt.u32.totalorder %s911_s23, %s907_s1  ;;  %p915_p10 = scmp.lt.u32.totalorder %s907_s1, %s1301_s15 }
 0x167   : > { %p909_p2 = pnand %p908_p4, %p1156_p3 }
 0x168   : > { %p914_p9 = por %p913_p8, %p912_p6 }
 0x169   : > { %p910_p5 = pneg %p909_p2 }
 0x16a   : > { %p916_p11 = por %p915_p10, %p914_p9 }
 0x16c   : > { %p917_p0 = pnand %p916_p11, %p910_p5 }
 0x16e   : > { %920 = shalt.err (!%p917_p0)
}
 0x16f   : > { %757 = dma.vmem_to_hbm [thread:$0]  (%p1156_p3), %s1296_s9, 128, %s1301_s15, %s521_s2  }
 0x170   : > { %s570_s26 = sshll.u32 %s1235_s7, 4  ;;  %s1050_s27 = smov [#allocation6]   ;;  %s571_s26 = int_to_ptr.vmem [resolvable:$true] %s570_s26 }
 0x171   : > { %s921_s24 = scalar_lea.vmem %s571_s26, 16  ;;  %s925_s29 = sshll.u32 %s1050_s27, 4  ;;  %s926_s29 = int_to_ptr.vmem [resolvable:$false] %s925_s29 }
 0x172   : > { %p922_p1 = scmp.ne.s32.totalorder %s571_s26, %s921_s24  ;;  %s927_s0 = scalar_lea.vmem %s926_s29, 32 }
 0x173   : > { %p928_p5 = scmp.lt.s32.totalorder %s571_s26, %s926_s29  ;;  %p929_p6 = scmp.lt.s32.totalorder %s927_s0, %s921_s24 }
 0x174   : > { %p923_p4 = pnand %p922_p1, %p1185_p12 }
 0x175   : > { %p930_p8 = por %p929_p6, %p928_p5 }
 0x176   : > { %p924_p2 = pneg %p923_p4 }
 0x178   : > { %p931_p9 = pnand %p930_p8, %p924_p2 }
 0x17a   : > { %934 = shalt.err (!%p931_p9)
}
 0x17b   : > { %s935_s11 = scalar_lea.hbm %s1308_s12, 16  ;;  %s939_s15 = scalar_lea.hbm %s1399_s5, 32 }
 0x17c   : > { %p936_p3 = scmp.ne.s32.totalorder %s1308_s12, %s935_s11  ;;  %p940_p0 = scmp.lt.u32.totalorder %s1308_s12, %s1399_s5 }
 0x17d   : > { %p941_p1 = scmp.lt.u32.totalorder %s939_s15, %s935_s11  ;;  %p943_p2 = scmp.lt.u32.totalorder %s935_s11, %s1308_s12 }
 0x17e   : > { %p937_p10 = pnand %p936_p3, %p1185_p12 }
 0x17f   : > { %p942_p4 = por %p941_p1, %p940_p0 }
 0x180   : > { %p938_p11 = pneg %p937_p10 }
 0x181   : > { %p944_p5 = por %p943_p2, %p942_p4 }
 0x183   : > { %p945_p6 = pnand %p944_p5, %p938_p11 }
 0x185   : > { %948 = shalt.err (!%p945_p6)
}
 0x186   : > { %759 = dma.vmem_to_hbm [thread:$0]  (%p1185_p12), %s571_s26, 16, %s1308_s12, %s526_s18  }
 0x187 PF: > { %p773_p8 = scmp.ge.s32.totalorder %s1043_s28, 2  ;;  %s582_s1 = sand.u32 1, %s1015_s21  }
 0x188   : > { %s583_s4 = scalar_lea.sflag [#allocation3], %s582_s1 }
 0x189   : > { %p764_p9 = pnand %p773_p8, %p1173_p7 }
 0x18b   : > { %994 = dma.done.wait (!%p764_p9), %s583_s4, 128  }
 0x18c   : > { %996 = vsyncadd (!%p764_p9), %s583_s4, 4294967168  ;;  %s1436_s25 = sadd.s32 4294967294, %s1043_s28   ;;  %p767_p3 = pnand %p773_p8, %p1197_p13 }
 0x18d   : > { %s591_s23 = sand.u32 1, %s1436_s25  }
 0x18e   : > { %s592_s17 = scalar_lea.sflag [#allocation5], %s591_s23 }
 0x18f   : > { %998 = dma.done.wait (!%p767_p3), %s592_s17, 32  }
 0x190   : > { %1000 = vsyncadd (!%p767_p3), %s592_s17, 4294967264  ;;  %s22_s28 = sadd.s32 1, %s1043_s28   ;;  %s1437_s14 = sld [smem:[#allocation9_spill]] }
 0x191   : > { %p19_p12 = scmp.ge.s32.totalorder %s22_s28, 14   ;;  %s1438_s23 = sld [smem:[#allocation14_spill]] }
 0x192   : > { %s1439_s24 = sld [smem:[#allocation10_spill]]  ;;  %s1440_s25 = sld [smem:[#allocation11_spill]] }
 0x193   : > { %s1441_s26 = sld [smem:[#allocation12_spill]]  ;;  %s1442_s27 = sld [smem:[#allocation13_spill]] }
 0x194   : > { %s1443_s18 = smov %s1007_s19  ;;  %s1444_s19 = smov %s1011_s20 }
 0x195   : > { %s1445_s20 = smov %s1190_s30  ;;  %s1446_s21 = smov %s1019_s22 }
 0x196   : > { %s1447_s22 = smov %s1437_s14  ;;  %21 = sbr.rel (!%p19_p12) target bundleno = 14 (0xe), region = 115 }
 0x19d   :  { %604 = vsyncpa [#allocation3], 1 }
 0x19e   :  { %606 = vsyncpa [#allocation3 + $0x1], 1 }
 0x19f   :  { %607 = vsyncpa [#allocation5], 1 }
 0x1a0   :  { %609 = vsyncpa [#allocation5 + $0x1], 1 }

</bundles_post_ra>
